<compile_context>
chip_gen: v5e
topology: v5e:2x2
jax: 0.10.0
libtpu: 0.0.40
codegen_flags: <defaults>
</compile_context>

<pallas_src>
import functools

import jax
import jax.numpy as jnp
from jax.experimental import pallas as pl
from jax.experimental.pallas import tpu as pltpu

# ---------------- module hyperparameters (fixed, deterministic) ----------------
AC_DIM = 8        # ac_dim
OB_DIM = 16       # ob_dim
N_LAYERS = 2      # n_layers (hidden Linear->Tanh blocks); kernel hard-codes 2
SIZE = 32         # hidden width
BATCH = 8         # small demo batch


def mlp_policy_kernel(obs_ref,
                      w0_ref, b0_ref,
                      w1_ref, b1_ref,
                      wo_ref, bo_ref,
                      mean_ref):
    """One batch tile of the mean_net MLP. Weights stay VMEM-resident."""
    x = obs_ref[...]                                                    # (TB, OB_DIM)

    # hidden layer 0: Linear -> Tanh
    h = jnp.tanh(jnp.dot(x, w0_ref[...],
                         preferred_element_type=jnp.float32) + b0_ref[...])   # (TB, SIZE)

    # hidden layer 1: Linear -> Tanh
    h = jnp.tanh(jnp.dot(h, w1_ref[...],
                         preferred_element_type=jnp.float32) + b1_ref[...])   # (TB, SIZE)

    # output layer: Linear (identity activation), true action width (no lane padding)
    mean_ref[...] = (jnp.dot(h, wo_ref[...],
                             preferred_element_type=jnp.float32) + bo_ref[...])  # (TB, AC_DIM)


@functools.partial(jax.jit, static_argnames=("block_batch",))
def mlp_policy_forward(obs, params, block_batch=2048):
    """Returns (means, std) — the parameters of the MultivariateNormal."""
    w0, b0, w1, b1, wo, bo, logstd = params
    n = obs.shape[0]

    # ---- batch tile selection (all static at trace time) ----
    n8 = ((n + 7) // 8) * 8                         # sublane-align the batch
    tb = max(8, (min(block_batch, n8) // 8) * 8)    # aligned, capped tile
    if n8 >= 16 and pl.cdiv(n8, tb) < 2:
        # Guarantee >= 2 grid steps so the "parallel" batch axis can be
        # sharded over both TensorCores on v7x (free on v5e/v6e).
        tb = max(8, ((n8 // 2) // 8) * 8)
    n_pad = pl.cdiv(n8, tb) * tb
    if n_pad != n:
        obs = jnp.pad(obs, ((0, n_pad - n), (0, 0)))
    grid = (n_pad // tb,)

    # ---- scoped-VMEM estimate (obs/means tiles lane-pad to 128 in VMEM,
    #      double-buffered; weights are a few KiB) ----
    tile_vmem = 2 * (2 * tb * 128 * 4)                       # obs + means, x2 buffers
    weights_vmem = 2 * 4 * (OB_DIM * SIZE + SIZE + SIZE * SIZE + SIZE
                            + SIZE * AC_DIM + AC_DIM)
    vmem_needed = tile_vmem + weights_vmem + (1 << 20)       # + 1 MiB slack
    cp_kwargs = dict(dimension_semantics=("parallel",))
    if vmem_needed > (16 << 20):                             # v5e default scoped limit
        cp_kwargs["vmem_limit_bytes"] = min(vmem_needed, 60 << 20)
    compiler_params = pltpu.CompilerParams(**cp_kwargs)

    # ---- advisory cost estimate (streaming-bound tiny MLP) ----
    flops = 2 * n_pad * (OB_DIM * SIZE + SIZE * SIZE + SIZE * AC_DIM)
    transcendentals = 2 * n_pad * SIZE                       # tanh
    bytes_accessed = 4 * (n_pad * (OB_DIM + AC_DIM)          # obs in, means out
                          + OB_DIM * SIZE + SIZE             # w0, b0
                          + SIZE * SIZE + SIZE               # w1, b1
                          + SIZE * AC_DIM + AC_DIM)          # wo, bo

    means_padded = pl.pallas_call(
        mlp_policy_kernel,
        out_shape=jax.ShapeDtypeStruct((n_pad, AC_DIM), jnp.float32),
        grid_spec=pltpu.PrefetchScalarGridSpec(
            num_scalar_prefetch=0,
            grid=grid,
            in_specs=[
                pl.BlockSpec((tb, OB_DIM), lambda i: (i, 0)),     # obs: streamed
                pl.BlockSpec((OB_DIM, SIZE), lambda i: (0, 0)),   # w0: resident
                pl.BlockSpec((1, SIZE), lambda i: (0, 0)),        # b0
                pl.BlockSpec((SIZE, SIZE), lambda i: (0, 0)),     # w1
                pl.BlockSpec((1, SIZE), lambda i: (0, 0)),        # b1
                pl.BlockSpec((SIZE, AC_DIM), lambda i: (0, 0)),   # wo
                pl.BlockSpec((1, AC_DIM), lambda i: (0, 0)),      # bo
            ],
            out_specs=pl.BlockSpec((tb, AC_DIM), lambda i: (i, 0)),  # true-width means
        ),
        compiler_params=compiler_params,
        cost_estimate=pl.CostEstimate(flops=flops,
                                      transcendentals=transcendentals,
                                      bytes_accessed=bytes_accessed),
    )(obs, w0, b0, w1, b1, wo, bo)

    means = means_padded[:n]
    std = jnp.exp(logstd)        # obs-independent: hoisted out of the kernel
    return means, std


def init_params(key):
    """Deterministic synthetic init mimicking nn.Linear (uniform +/- 1/sqrt(fan_in))."""
    ks = jax.random.split(key, 7)

    def linear(kw, kb, fan_in, fan_out):
        bound = 1.0 / jnp.sqrt(jnp.float32(fan_in))
        w = jax.random.uniform(kw, (fan_in, fan_out), jnp.float32, -bound, bound)
        b = jax.random.uniform(kb, (1, fan_out), jnp.float32, -bound, bound)
        return w, b

    w0, b0 = linear(ks[0], ks[1], OB_DIM, SIZE)
    w1, b1 = linear(ks[2], ks[3], SIZE, SIZE)
    wo, bo = linear(ks[4], ks[5], SIZE, AC_DIM)
    logstd = jnp.zeros((AC_DIM,), jnp.float32)   # nn.Parameter(torch.zeros(ac_dim))
    return (w0, b0, w1, b1, wo, bo, logstd)


def reference_forward(obs, params):
    w0, b0, w1, b1, wo, bo, logstd = params
    h = jnp.tanh(obs @ w0 + b0)
    h = jnp.tanh(h @ w1 + b1)
    means = h @ wo + bo
    return means, jnp.exp(logstd)


if __name__ == "__main__":
    key = jax.random.PRNGKey(0)
    k_obs, k_obs2, k_obs3, k_params = jax.random.split(key, 4)
    params = init_params(k_params)

    # Small demo batch (single grid step — launch-latency dominated by design).
    obs = jax.random.normal(k_obs, (BATCH, OB_DIM), jnp.float32)
    means, std = mlp_policy_forward(obs, params)
    means = jax.block_until_ready(means)
    std = jax.block_until_ready(std)
    ref_means, ref_std = reference_forward(obs, params)
    assert means.shape == (BATCH, AC_DIM)
    assert std.shape == (AC_DIM,)
    assert jnp.allclose(means, ref_means, atol=1e-5, rtol=1e-5)
    assert jnp.allclose(std, ref_std, atol=1e-6, rtol=1e-6)

    # Non-multiple batch with a forced small tile: exercises the multi-step
    # grid, batch-row padding, and the true-width output slicing path.
    obs2 = jax.random.normal(k_obs2, (20, OB_DIM), jnp.float32)
    means2, std2 = mlp_policy_forward(obs2, params, block_batch=8)
    means2 = jax.block_until_ready(means2)
    ref_means2, _ = reference_forward(obs2, params)
    assert means2.shape == (20, AC_DIM)
    assert jnp.allclose(means2, ref_means2, atol=1e-5, rtol=1e-5)

    # Default tile path where the batch would fit in one step: exercises the
    # ">= 2 grid steps" split (48 rows -> 2 steps of 24) for v7x megacore.
    obs3 = jax.random.normal(k_obs3, (48, OB_DIM), jnp.float32)
    means3, _ = mlp_policy_forward(obs3, params)
    means3 = jax.block_until_ready(means3)
    ref_means3, _ = reference_forward(obs3, params)
    assert means3.shape == (48, AC_DIM)
    assert jnp.allclose(means3, ref_means3, atol=1e-5, rtol=1e-5)

    print("KERNEL_OK")
</pallas_src>

<mosaic_0001>
module attributes {stable_mosaic.version = 11 : i64} {
  func.func @mlp_policy_kernel(%arg0: i32, %arg1: memref<8x16xf32, #tpu.memory_space<vmem>>, %arg2: memref<16x32xf32, #tpu.memory_space<vmem>>, %arg3: memref<1x32xf32, #tpu.memory_space<vmem>>, %arg4: memref<32x32xf32, #tpu.memory_space<vmem>>, %arg5: memref<1x32xf32, #tpu.memory_space<vmem>>, %arg6: memref<32x8xf32, #tpu.memory_space<vmem>>, %arg7: memref<1x8xf32, #tpu.memory_space<vmem>>, %arg8: memref<8x8xf32, #tpu.memory_space<vmem>>) attributes {dimension_semantics = [#tpu.dimension_semantics<parallel>], iteration_bounds = array<i64: 1>, scalar_prefetch = 0 : i64, scratch_operands = 0 : i64, tpu.core_type = #tpu.core_type<tc>, window_params = [{transform_indices = @transform_0, window_bounds = array<i64: 8, 16>}, {pipeline_mode = #tpu.pipeline_mode<synchronous>, transform_indices = @transform_1, window_bounds = array<i64: 16, 32>}, {pipeline_mode = #tpu.pipeline_mode<synchronous>, transform_indices = @transform_2, window_bounds = array<i64: 1, 32>}, {pipeline_mode = #tpu.pipeline_mode<synchronous>, transform_indices = @transform_3, window_bounds = array<i64: 32, 32>}, {pipeline_mode = #tpu.pipeline_mode<synchronous>, transform_indices = @transform_4, window_bounds = array<i64: 1, 32>}, {pipeline_mode = #tpu.pipeline_mode<synchronous>, transform_indices = @transform_5, window_bounds = array<i64: 32, 8>}, {pipeline_mode = #tpu.pipeline_mode<synchronous>, transform_indices = @transform_6, window_bounds = array<i64: 1, 8>}, {transform_indices = @transform_7, window_bounds = array<i64: 8, 8>}]} {
    %c0 = arith.constant 0 : index
    %c0_0 = arith.constant 0 : index
    %0 = vector.load %arg1[%c0, %c0_0] : memref<8x16xf32, #tpu.memory_space<vmem>>, vector<8x16xf32>
    %c0_1 = arith.constant 0 : index
    %c0_2 = arith.constant 0 : index
    %1 = vector.load %arg2[%c0_1, %c0_2] : memref<16x32xf32, #tpu.memory_space<vmem>>, vector<16x32xf32>
    %cst = arith.constant dense<0.000000e+00> : vector<8x32xf32>
    %2 = tpu.matmul %0, %1, %cst {dimension_numbers = #tpu.dot_dimension_numbers<[1], [0], [0], [1], [0, 0, 1, 1], [], []>} : vector<8x16xf32>, vector<16x32xf32>, vector<8x32xf32> -> vector<8x32xf32>
    %c0_3 = arith.constant 0 : index
    %c0_4 = arith.constant 0 : index
    %3 = vector.load %arg3[%c0_3, %c0_4] : memref<1x32xf32, #tpu.memory_space<vmem>>, vector<1x32xf32>
    %4 = vector.broadcast %3 : vector<1x32xf32> to vector<8x32xf32>
    %5 = arith.addf %2, %4 : vector<8x32xf32>
    %6 = math.tanh %5 : vector<8x32xf32>
    %c0_5 = arith.constant 0 : index
    %c0_6 = arith.constant 0 : index
    %7 = vector.load %arg4[%c0_5, %c0_6] : memref<32x32xf32, #tpu.memory_space<vmem>>, vector<32x32xf32>
    %cst_7 = arith.constant dense<0.000000e+00> : vector<8x32xf32>
    %8 = tpu.matmul %6, %7, %cst_7 {dimension_numbers = #tpu.dot_dimension_numbers<[1], [0], [0], [1], [0, 0, 1, 1], [], []>} : vector<8x32xf32>, vector<32x32xf32>, vector<8x32xf32> -> vector<8x32xf32>
    %c0_8 = arith.constant 0 : index
    %c0_9 = arith.constant 0 : index
    %9 = vector.load %arg5[%c0_8, %c0_9] : memref<1x32xf32, #tpu.memory_space<vmem>>, vector<1x32xf32>
    %10 = vector.broadcast %9 : vector<1x32xf32> to vector<8x32xf32>
    %11 = arith.addf %8, %10 : vector<8x32xf32>
    %12 = math.tanh %11 : vector<8x32xf32>
    %c0_10 = arith.constant 0 : index
    %c0_11 = arith.constant 0 : index
    %13 = vector.load %arg6[%c0_10, %c0_11] : memref<32x8xf32, #tpu.memory_space<vmem>>, vector<32x8xf32>
    %cst_12 = arith.constant dense<0.000000e+00> : vector<8x8xf32>
    %14 = tpu.matmul %12, %13, %cst_12 {dimension_numbers = #tpu.dot_dimension_numbers<[1], [0], [0], [1], [0, 0, 1, 1], [], []>} : vector<8x32xf32>, vector<32x8xf32>, vector<8x8xf32> -> vector<8x8xf32>
    %c0_13 = arith.constant 0 : index
    %c0_14 = arith.constant 0 : index
    %15 = vector.load %arg7[%c0_13, %c0_14] : memref<1x8xf32, #tpu.memory_space<vmem>>, vector<1x8xf32>
    %16 = vector.broadcast %15 : vector<1x8xf32> to vector<8x8xf32>
    %17 = arith.addf %14, %16 : vector<8x8xf32>
    %c0_15 = arith.constant 0 : index
    %c0_16 = arith.constant 0 : index
    %18 = vector.load %arg8[%c0_15, %c0_16] : memref<8x8xf32, #tpu.memory_space<vmem>>, vector<8x8xf32>
    tpu.vector_store %arg8[%c0_15, %c0_16], %17 {strides = array<i32>} : memref<8x8xf32, #tpu.memory_space<vmem>>, vector<8x8xf32>,
    return
  }
  func.func @transform_0(%arg0: i32) -> (i32, i32) {
    %c0_i32 = arith.constant 0 : i32
    %c0_i32_0 = arith.constant 0 : i32
    return %arg0, %c0_i32 : i32, i32
  }
  func.func @transform_1(%arg0: i32) -> (i32, i32) {
    %c0_i32 = arith.constant 0 : i32
    %c0_i32_0 = arith.constant 0 : i32
    %c0_i32_1 = arith.constant 0 : i32
    return %c0_i32, %c0_i32_0 : i32, i32
  }
  func.func @transform_2(%arg0: i32) -> (i32, i32) {
    %c0_i32 = arith.constant 0 : i32
    %c0_i32_0 = arith.constant 0 : i32
    %c0_i32_1 = arith.constant 0 : i32
    return %c0_i32, %c0_i32_0 : i32, i32
  }
  func.func @transform_3(%arg0: i32) -> (i32, i32) {
    %c0_i32 = arith.constant 0 : i32
    %c0_i32_0 = arith.constant 0 : i32
    %c0_i32_1 = arith.constant 0 : i32
    return %c0_i32, %c0_i32_0 : i32, i32
  }
  func.func @transform_4(%arg0: i32) -> (i32, i32) {
    %c0_i32 = arith.constant 0 : i32
    %c0_i32_0 = arith.constant 0 : i32
    %c0_i32_1 = arith.constant 0 : i32
    return %c0_i32, %c0_i32_0 : i32, i32
  }
  func.func @transform_5(%arg0: i32) -> (i32, i32) {
    %c0_i32 = arith.constant 0 : i32
    %c0_i32_0 = arith.constant 0 : i32
    %c0_i32_1 = arith.constant 0 : i32
    return %c0_i32, %c0_i32_0 : i32, i32
  }
  func.func @transform_6(%arg0: i32) -> (i32, i32) {
    %c0_i32 = arith.constant 0 : i32
    %c0_i32_0 = arith.constant 0 : i32
    %c0_i32_1 = arith.constant 0 : i32
    return %c0_i32, %c0_i32_0 : i32, i32
  }
  func.func @transform_7(%arg0: i32) -> (i32, i32) {
    %c0_i32 = arith.constant 0 : i32
    %c0_i32_0 = arith.constant 0 : i32
    return %arg0, %c0_i32 : i32, i32
  }
}

</mosaic_0001>

<bundles_post_ra>
// kernel: mlp_policy_forward.1
= control target key start
LH: loop header
LB: loop body
LE: loop exit
PB: predicated region body
PF: predicated region fallthrough
CT: control target
= control target key end

     0   :  { %12 = vsyncpa [#allocation3], 0  ;;  %s355_s0 = inlined_call_operand.vmem [shape: f32[8,16], index: 0, kind: input, shape index: {}]   ;;  %s356_s1 = inlined_call_operand.hbm [shape: f32[16,32], index: 1, kind: input, shape index: {}]   ;;  %s357_s2 = inlined_call_operand.vmem [shape: f32[1,32], index: 2, kind: input, shape index: {}]   ;;  %s358_s3 = inlined_call_operand.vmem [shape: f32[32,32], index: 3, kind: input, shape index: {}]   ;;  %s359_s4 = inlined_call_operand.vmem [shape: f32[1,32], index: 4, kind: input, shape index: {}]   ;;  %s360_s5 = inlined_call_operand.vmem [shape: f32[32,8], index: 5, kind: input, shape index: {}]   ;;  %s361_s6 = inlined_call_operand.hbm [shape: f32[1,8], index: 6, kind: input, shape index: {}]   ;;  %s362_s7 = inlined_call_operand.hbm [shape: f32[8,8], index: 7, kind: output, shape index: {}]  }
   0x1   :  { %13 = vsyncpa [#allocation6], 0 }
   0x2   :  { %14 = vsyncpa [#allocation4], 0  ;;  %s21_s26 = sshll.u32 %s356_s1, 4  ;;  %s266_s27 = smov [#allocation2]   ;;  %s22_s26 = int_to_ptr.hbm [resolvable:$true] %s21_s26 }
   0x3   :  { %s23_s28 = sshll.u32 %s266_s27, 4  ;;  %s43_s8 = sshll.u32 %s361_s6, 4  ;;  %s24_s28 = int_to_ptr.vmem [resolvable:$true] %s23_s28  ;;  %s44_s8 = int_to_ptr.hbm [resolvable:$true] %s43_s8 }
   0x4   :  { %s267_s9 = smov 128   ;;  %s268_s10 = smov 8  }
   0x5   :  { %29 = dma.hbm_to_vmem [thread:$0]  %s22_s26, 256, %s24_s28, [#allocation3], %s267_s9, %s267_s9, %s268_s10  }
   0x6   :  { %s269_s11 = smov [#allocation5]  }
   0x7   :  { %s45_s12 = sshll.u32 %s269_s11, 4  ;;  %s46_s12 = int_to_ptr.vmem [resolvable:$true] %s45_s12 }
   0x8   :  { %48 = dma.hbm_to_vmem [thread:$0]  %s44_s8, 16, %s46_s12, [#allocation6]  }
   0x9   :  { %260 = dma.done.wait [#allocation3], 256  }
   0xa   :  { %261 = vsyncadd [#allocation3], 4294967040 }
   0xb   :  { %262 = dma.done.wait [#allocation6], 16  }
   0xc   :  { %263 = vsyncadd [#allocation6], 4294967280  ;;  %v59_v0 = vld [vmem:[#allocation2 + $0x8] sm:$0xff]  ;;  %v58_v1 = vld [vmem:[#allocation2] sm:$0xff]  ;;  %vm64_vm0 = vcmask 130048   ;;  %vm97_vm1 = vcmask 261120  }
   0xd   :  { %82 = vmatpush.msra.mxu0 %v59_v0  ;;  %v57_v2 = vld [vmem:[%s355_s0] sm:$0xff]  ;;  %v92_v3 = vld [vmem:[%s358_s3 + $0x18] sm:$0xff]  ;;  %v91_v4 = vld [vmem:[%s358_s3 + $0x10] sm:$0xff]  ;;  %s270_s30 = smov [#allocation7]   ;;  %s162_s11 = sshll.u32 %s362_s7, 4  ;;  %vm153_vm2 = vcmask 64512   ;;  %s163_s11 = int_to_ptr.hbm [resolvable:$true] %s162_s11 }
   0xe   :  { %113 = vmatpush.msra.mxu1 %v92_v3  ;;  %v90_v5 = vld [vmem:[%s358_s3 + $0x8] sm:$0xff]  ;;  %v89_v6 = vld [vmem:[%s358_s3] sm:$0xff]  ;;  %v125_v11 = vld [vmem:[%s360_s5 + $0x18] sm:$0xff]  ;;  %s160_s8 = sshll.u32 %s270_s30, 4  ;;  %s161_s8 = int_to_ptr.vmem [resolvable:$true] %s160_s8 }
   0xf   :  { %83 = vmatpush.msra.mxu0 %v58_v1  ;;  %v181_v7 = vld [vmem:[%s357_s2] ss:$0 sm:$0xff]  ;;  %145 = vmatpush.msra.mxu2 %v125_v11  ;;  %v124_v12 = vld [vmem:[%s360_s5 + $0x10] sm:$0xff]  ;;  %v123_v13 = vld [vmem:[%s360_s5 + $0x8] sm:$0xff] }
  0x10   :  { %173 = vmatmul.msk.f32.vlgmr.msra.gmra.mxu0 %vm64_vm0, %v57_v2  ;;  %114 = vmatpush.msra.mxu1 %v91_v4  ;;  %v122_v14 = vld [vmem:[%s360_s5] sm:$0xff]  ;;  %v183_v19 = vld [vmem:[#allocation5] ss:$0 sm:$0xff] }
  0x11   :  { %146 = vmatpush.msra.mxu2 %v124_v12  ;;  %v182_v15 = vld [vmem:[%s359_s4] ss:$0 sm:$0xff] }
  0x12   :  { %115 = vmatpush.msra.mxu1 %v90_v5 }
  0x13   :  { %147 = vmatpush.msra.mxu2 %v123_v13 }
  0x14   :  { %116 = vmatpush.msra.mxu1 %v89_v6 }
  0x15   :  { %148 = vmatpush.msra.mxu2 %v122_v14 }
  0x8d   :  { %v85_v8 = vpop.f32.mrf.mxu0 }
  0x8e   :  { %v86_v9 = vadd.f32 %v181_v7, %v85_v8 }
  0x90   :  { %184 = vtanh.f32 %v86_v9 }
  0x96   :  { %v185_v10 = vpop.eup %184 }
  0x97   :  { %174 = vmatmul.msk.f32.vlgmr.msra.gmra.mxu1 %vm97_vm1, %v185_v10 }
 0x114   :  { %v118_v16 = vpop.f32.mrf.mxu1 }
 0x115   :  { %v119_v17 = vadd.f32 %v182_v15, %v118_v16 }
 0x117   :  { %186 = vtanh.f32 %v119_v17 }
 0x11d   :  { %v187_v18 = vpop.eup %186 }
 0x11e   :  { %175 = vmatmul.msk.f32.vlgmr.msra.gmra.mxu2 %vm97_vm1, %v187_v18 }
 0x1a1   :  { %v150_v20 = vpop.f32.mrf.mxu2 }
 0x1a2   :  { %v151_v21 = vadd.f32 %v183_v19, %v150_v20 }
 0x1a4   :  { %154 = vst.msk [vmem:[#allocation7] sm:$0xff] %vm153_vm2, %v151_v21 }
 0x1a5   :  { %165 = dma.vmem_to_hbm [thread:$0]  %s161_s8, 128, %s163_s11, [#allocation4]  }
 0x1a6   :  { %264 = dma.done.wait [#allocation4], 128  }
 0x1a7   :  { %265 = vsyncadd [#allocation4], 4294967168 }
 0x1a8   :  { %170 = vsyncpa [#allocation3], 1 }
 0x1a9   :  { %171 = vsyncpa [#allocation6], 1 }
 0x1aa   :  { %172 = vsyncpa [#allocation4], 1 }

</bundles_post_ra>
